<compile_context>
chip_gen: v5e
topology: v5e:2x2
jax: 0.10.0
libtpu: 0.0.40
codegen_flags: <defaults>
</compile_context>

<pallas_src>
import functools

import jax
import jax.numpy as jnp
from jax import lax
from jax.experimental import pallas as pl
from jax.experimental.pallas import tpu as pltpu


def _round_up(x, m):
    return (x + m - 1) // m * m


def _lowrank_kernel(x_ref, w_ref, xa_ref, b_ref, bias_ref, o_ref, *scratch):
    """Grid point (i, j, k): one (tm, tn) output tile, K-step k.

    x_ref   : (tm, tk)   input tile (compute dtype)
    w_ref   : (tn, tk)   weight tile, native [out_dim, in_dim] layout
    xa_ref  : (tm, rank) precomputed scale * (x @ A), f32, resident across j,k
    b_ref   : (tn, rank) B tile, native [out_dim, rank] layout, f32
    bias_ref: (1, tn)    f32 bias tile
    o_ref   : (tm, tn)   output tile
    scratch : optional (tm, tn) f32 accumulator (only when output is not f32)
    """
    k = pl.program_id(2)
    acc_ref = scratch[0] if scratch else o_ref   # f32 output accumulates in place

    @pl.when(k == 0)
    def _init():
        acc_ref[...] = jnp.zeros_like(acc_ref)

    # Base path: x @ W.T, contracting the last dims of both operands (keeps W
    # in its native layout -- no wrapper-side transpose).
    acc_ref[...] += lax.dot_general(
        x_ref[...], w_ref[...],
        dimension_numbers=(((1,), (1,)), ((), ())),
        preferred_element_type=jnp.float32)

    @pl.when(k == pl.num_programs(2) - 1)
    def _finalize():
        # Low-rank path: (scale * x @ A) @ B.T  -- tiny f32 matmul, once per
        # output tile, fused with the bias add.
        lr = lax.dot_general(
            xa_ref[...], b_ref[...],
            dimension_numbers=(((1,), (1,)), ((), ())),
            preferred_element_type=jnp.float32)
        out = acc_ref[...] + lr + bias_ref[...].astype(jnp.float32)
        o_ref[...] = out.astype(o_ref.dtype)


def lowrank_adapter_forward(x, weight, A, B, bias, *, alpha, rank,
                            tile_m=256, tile_n=512, tile_k=1024,
                            compute_dtype=jnp.bfloat16,
                            weight_buffers=2):
    """y = x @ W.T + (alpha/rank) * (x @ A) @ B.T + bias.

    x: [..., in_dim]; weight: [out_dim, in_dim]; A: [in_dim, rank];
    B: [out_dim, rank]; bias: [out_dim].  Returns [..., out_dim].

    compute_dtype: matmul input dtype for the base GEMM (default bf16; f32
    accumulation).  Output keeps x.dtype.  weight_buffers > 2 deepens the
    pipeline on the weight stream (useful for small-M, decode-style shapes).
    """
    assert tile_m % 32 == 0 and tile_n % 128 == 0 and tile_k % 128 == 0

    orig_lead = x.shape[:-1]
    in_dim = x.shape[-1]
    out_dim, rank_b = B.shape
    assert weight.shape == (out_dim, in_dim)
    assert A.shape == (in_dim, rank) and rank_b == rank
    out_dtype = x.dtype

    x2d = x.reshape(-1, in_dim)
    M = x2d.shape[0]
    scale = float(alpha) / float(rank)

    if compute_dtype is None:
        compute_dtype = jnp.float32
    compute_dtype = jnp.dtype(compute_dtype)

    # Tiny low-rank intermediate, precomputed outside the kernel.  Kept in f32:
    # its HBM footprint is only M*rank and the final (tm,rank)x(tn,rank) matmul
    # runs once per output tile, so full precision is essentially free.
    xa_f32 = jnp.dot(x2d.astype(jnp.float32), A.astype(jnp.float32),
                     preferred_element_type=jnp.float32) * scale
    b_f32 = B.astype(jnp.float32)
    bias2d = bias.reshape(1, out_dim).astype(jnp.float32)

    x_c = x2d.astype(compute_dtype)
    w_c = weight.astype(compute_dtype)        # native [out_dim, in_dim] layout

    # Per-generation VMEM gating: v7x has 64 MiB per TensorCore (vs 128 MiB on
    # v5e/v6e) -- clamp larger user-supplied tile tables there.
    try:
        vmem_cap = int(pltpu.get_tpu_info().vmem_capacity_bytes)
    except Exception:
        vmem_cap = 64 * 1024 * 1024           # conservative (v7x-class)
    if vmem_cap < 100 * 1024 * 1024:
        tile_m = min(tile_m, 512)
        tile_n = min(tile_n, 512)
        tile_k = min(tile_k, 1024)

    # Sublane alignment of the M tile: bf16 packs 2 rows/sublane, 8-bit 4.
    if compute_dtype == jnp.dtype(jnp.bfloat16):
        m_align = 16
    elif compute_dtype.itemsize == 1:
        m_align = 32
    else:
        m_align = 8

    tm = min(tile_m, _round_up(M, m_align))
    tn = out_dim if out_dim <= tile_n else tile_n   # full dim for small layers
    tk = in_dim if in_dim <= tile_k else tile_k

    M_p = _round_up(M, tm)
    N_p = _round_up(out_dim, tn)
    K_p = _round_up(in_dim, tk)

    # Zero padding: exact for the K reduction; padded M rows / N cols are
    # sliced off below.  For tile-multiple shapes these are no-ops.
    if M_p != M or K_p != in_dim:
        x_c = jnp.pad(x_c, ((0, M_p - M), (0, K_p - in_dim)))
    if N_p != out_dim or K_p != in_dim:
        w_c = jnp.pad(w_c, ((0, N_p - out_dim), (0, K_p - in_dim)))
    if M_p != M:
        xa_f32 = jnp.pad(xa_f32, ((0, M_p - M), (0, 0)))
    if N_p != out_dim:
        b_f32 = jnp.pad(b_f32, ((0, N_p - out_dim), (0, 0)))
        bias2d = jnp.pad(bias2d, ((0, 0), (0, N_p - out_dim)))

    grid = (M_p // tm, N_p // tn, K_p // tk)

    # f32 outputs accumulate directly in o_ref; narrower outputs use f32 scratch.
    acc_in_output = jnp.dtype(out_dtype) == jnp.dtype(jnp.float32)
    scratch_shapes = [] if acc_in_output else [pltpu.VMEM((tm, tn), jnp.float32)]

    # Raise the scoped VMEM limit only if the footprint might exceed the
    # smallest default (16 MiB on v5e); default tiles stay far below it.
    cb = compute_dtype.itemsize
    ob = jnp.dtype(out_dtype).itemsize
    n_wbuf = max(2, weight_buffers)
    est_vmem = (2 * tm * tk * cb + n_wbuf * tn * tk * cb
                + 2 * (tm * rank * 4 + tn * rank * 4 + tn * 4 + tm * tn * ob))
    if not acc_in_output:
        est_vmem += tm * tn * 4
    vmem_limit = None
    if est_vmem > 12 * 1024 * 1024:
        vmem_limit = min(2 * est_vmem, (vmem_cap * 3) // 4)

    w_spec = pl.BlockSpec((tn, tk), lambda i, j, k: (j, k))
    if weight_buffers > 2:
        # Deeper pipeline on the dominant weight stream (exposed-DMA shapes).
        w_spec = pl.BlockSpec((tn, tk), lambda i, j, k: (j, k),
                              pipeline_mode=pl.Buffered(weight_buffers))

    y = pl.pallas_call(
        _lowrank_kernel,
        out_shape=jax.ShapeDtypeStruct((M_p, N_p), out_dtype),
        grid_spec=pltpu.PrefetchScalarGridSpec(
            num_scalar_prefetch=0,
            grid=grid,
            in_specs=[
                pl.BlockSpec((tm, tk), lambda i, j, k: (i, k)),    # x
                w_spec,                                            # W (native)
                pl.BlockSpec((tm, rank), lambda i, j, k: (i, 0)),  # scale*(x@A)
                pl.BlockSpec((tn, rank), lambda i, j, k: (j, 0)),  # B (native)
                pl.BlockSpec((1, tn), lambda i, j, k: (0, j)),     # bias
            ],
            out_specs=pl.BlockSpec((tm, tn), lambda i, j, k: (i, j)),
            scratch_shapes=scratch_shapes,
        ),
        compiler_params=pltpu.CompilerParams(
            dimension_semantics=("parallel", "parallel", "arbitrary"),
            vmem_limit_bytes=vmem_limit),
    )(x_c, w_c, xa_f32, b_f32, bias2d)

    if M_p != M or N_p != out_dim:
        y = y[:M, :out_dim]
    return y.reshape(*orig_lead, out_dim)


def _xavier_normal(key, shape):
    fan_out, fan_in = shape[0], shape[1]   # matches torch xavier for 2-D
    std = (2.0 / (fan_in + fan_out)) ** 0.5
    return std * jax.random.normal(key, shape, dtype=jnp.float32)


if __name__ == "__main__":
    # Small shapes consistent with the module: batch=2, seq=8, hidden=32, rank=4.
    batch, seq = 2, 8
    in_dim, out_dim, rank = 32, 32, 4
    alpha = 1.0

    key = jax.random.PRNGKey(0)
    k_x, k_w, k_b, k_A, k_B = jax.random.split(key, 5)

    # Deterministic "linear layer" weights + bias.
    weight = _xavier_normal(k_w, (out_dim, in_dim))
    bias = 0.01 * jax.random.normal(k_b, (out_dim,), dtype=jnp.float32)

    # Low-rank factors (xavier) and the W -= alpha/rank * B @ A.T adjustment
    # from the module's _init_factors().
    A = _xavier_normal(k_A, (in_dim, rank))
    B = _xavier_normal(k_B, (out_dim, rank))
    weight = weight - (alpha / rank) * (B @ A.T)

    x = jax.random.normal(k_x, (batch, seq, in_dim), dtype=jnp.float32)

    # Reference (matches the PyTorch forward).
    ref = x @ weight.T + (alpha / rank) * (x @ A) @ B.T + bias

    # Exact f32 path.
    fwd_f32 = jax.jit(functools.partial(lowrank_adapter_forward,
                                        alpha=alpha, rank=rank,
                                        compute_dtype=jnp.float32))
    y_f32 = fwd_f32(x, weight, A, B, bias)
    jax.block_until_ready(y_f32)
    assert y_f32.shape == ref.shape
    assert jnp.allclose(y_f32, ref, atol=1e-4, rtol=1e-4), "f32 mismatch vs reference"

    # Default path: bf16 compute, f32 accumulation, f32 output.
    fwd = jax.jit(functools.partial(lowrank_adapter_forward,
                                    alpha=alpha, rank=rank))
    y_bf16 = fwd(x, weight, A, B, bias)
    jax.block_until_ready(y_bf16)
    assert jnp.allclose(y_bf16, ref, atol=2e-1, rtol=5e-2), "bf16-compute mismatch"

    # bf16 input/output (exercises the f32 scratch-accumulator path).
    y_b16 = fwd(x.astype(jnp.bfloat16), weight, A, B, bias)
    jax.block_until_ready(y_b16)
    assert y_b16.dtype == jnp.bfloat16
    assert jnp.allclose(y_b16.astype(jnp.float32), ref, atol=2e-1, rtol=5e-2), \
        "bf16-output mismatch"

    print("KERNEL_OK")
</pallas_src>

<mosaic_0001>
module attributes {stable_mosaic.version = 11 : i64} {
  func.func @_lowrank_kernel(%arg0: i32, %arg1: i32, %arg2: i32, %arg3: memref<16x32xf32, #tpu.memory_space<vmem>>, %arg4: memref<32x32xf32, #tpu.memory_space<vmem>>, %arg5: memref<16x4xf32, #tpu.memory_space<vmem>>, %arg6: memref<32x4xf32, #tpu.memory_space<vmem>>, %arg7: memref<1x32xf32, #tpu.memory_space<vmem>>, %arg8: memref<16x32xf32, #tpu.memory_space<vmem>>) attributes {dimension_semantics = [#tpu.dimension_semantics<parallel>, #tpu.dimension_semantics<parallel>, #tpu.dimension_semantics<arbitrary>], iteration_bounds = array<i64: 1, 1, 1>, scalar_prefetch = 0 : i64, scratch_operands = 0 : i64, tpu.core_type = #tpu.core_type<tc>, window_params = [{transform_indices = @transform_0, window_bounds = array<i64: 16, 32>}, {transform_indices = @transform_1, window_bounds = array<i64: 32, 32>}, {transform_indices = @transform_2, window_bounds = array<i64: 16, 4>}, {transform_indices = @transform_3, window_bounds = array<i64: 32, 4>}, {transform_indices = @transform_4, window_bounds = array<i64: 1, 32>}, {transform_indices = @transform_5, window_bounds = array<i64: 16, 32>}]} {
    %c0_i32 = arith.constant 0 : i32
    %0 = arith.cmpi eq, %arg2, %c0_i32 : i32
    %1 = arith.extui %0 : i1 to i32
    %c0_i32_0 = arith.constant 0 : i32
    %2 = arith.cmpi ne, %1, %c0_i32_0 : i32
    scf.if %2 {
      %cst_10 = arith.constant 0.000000e+00 : f32
      %12 = vector.broadcast %cst_10 : f32 to vector<16x32xf32>
      %c0_11 = arith.constant 0 : index
      %c0_12 = arith.constant 0 : index
      %13 = vector.load %arg8[%c0_11, %c0_12] : memref<16x32xf32, #tpu.memory_space<vmem>>, vector<16x32xf32>
      tpu.vector_store %arg8[%c0_11, %c0_12], %12 {strides = array<i32>} : memref<16x32xf32, #tpu.memory_space<vmem>>, vector<16x32xf32>,
    } else {
    }
    %c0 = arith.constant 0 : index
    %c0_1 = arith.constant 0 : index
    %3 = vector.load %arg8[%c0, %c0_1] : memref<16x32xf32, #tpu.memory_space<vmem>>, vector<16x32xf32>
    %c0_2 = arith.constant 0 : index
    %c0_3 = arith.constant 0 : index
    %4 = vector.load %arg3[%c0_2, %c0_3] : memref<16x32xf32, #tpu.memory_space<vmem>>, vector<16x32xf32>
    %c0_4 = arith.constant 0 : index
    %c0_5 = arith.constant 0 : index
    %5 = vector.load %arg4[%c0_4, %c0_5] : memref<32x32xf32, #tpu.memory_space<vmem>>, vector<32x32xf32>
    %cst = arith.constant dense<0.000000e+00> : vector<16x32xf32>
    %6 = tpu.matmul %4, %5, %cst {dimension_numbers = #tpu.dot_dimension_numbers<[1], [1], [0], [0], [0, 0, 1, 0], [], []>} : vector<16x32xf32>, vector<32x32xf32>, vector<16x32xf32> -> vector<16x32xf32>
    %7 = arith.addf %3, %6 : vector<16x32xf32>
    %c0_6 = arith.constant 0 : index
    %c0_7 = arith.constant 0 : index
    %8 = vector.load %arg8[%c0_6, %c0_7] : memref<16x32xf32, #tpu.memory_space<vmem>>, vector<16x32xf32>
    tpu.vector_store %arg8[%c0_6, %c0_7], %7 {strides = array<i32>} : memref<16x32xf32, #tpu.memory_space<vmem>>, vector<16x32xf32>,
    %c0_i32_8 = arith.constant 0 : i32
    %9 = arith.cmpi eq, %arg2, %c0_i32_8 : i32
    %10 = arith.extui %9 : i1 to i32
    %c0_i32_9 = arith.constant 0 : i32
    %11 = arith.cmpi ne, %10, %c0_i32_9 : i32
    scf.if %11 {
      %c0_10 = arith.constant 0 : index
      %c0_11 = arith.constant 0 : index
      %12 = vector.load %arg5[%c0_10, %c0_11] : memref<16x4xf32, #tpu.memory_space<vmem>>, vector<16x4xf32>
      %c0_12 = arith.constant 0 : index
      %c0_13 = arith.constant 0 : index
      %13 = vector.load %arg6[%c0_12, %c0_13] : memref<32x4xf32, #tpu.memory_space<vmem>>, vector<32x4xf32>
      %cst_14 = arith.constant dense<0.000000e+00> : vector<16x32xf32>
      %14 = tpu.matmul %12, %13, %cst_14 {dimension_numbers = #tpu.dot_dimension_numbers<[1], [1], [0], [0], [0, 0, 1, 0], [], []>} : vector<16x4xf32>, vector<32x4xf32>, vector<16x32xf32> -> vector<16x32xf32>
      %c0_15 = arith.constant 0 : index
      %c0_16 = arith.constant 0 : index
      %15 = vector.load %arg8[%c0_15, %c0_16] : memref<16x32xf32, #tpu.memory_space<vmem>>, vector<16x32xf32>
      %16 = arith.addf %15, %14 : vector<16x32xf32>
      %c0_17 = arith.constant 0 : index
      %c0_18 = arith.constant 0 : index
      %17 = vector.load %arg7[%c0_17, %c0_18] : memref<1x32xf32, #tpu.memory_space<vmem>>, vector<1x32xf32>
      %18 = vector.broadcast %17 : vector<1x32xf32> to vector<16x32xf32>
      %19 = arith.addf %16, %18 : vector<16x32xf32>
      %c0_19 = arith.constant 0 : index
      %c0_20 = arith.constant 0 : index
      %20 = vector.load %arg8[%c0_19, %c0_20] : memref<16x32xf32, #tpu.memory_space<vmem>>, vector<16x32xf32>
      tpu.vector_store %arg8[%c0_19, %c0_20], %19 {strides = array<i32>} : memref<16x32xf32, #tpu.memory_space<vmem>>, vector<16x32xf32>,
    } else {
    }
    return
  }
  func.func @transform_0(%arg0: i32, %arg1: i32, %arg2: i32) -> (i32, i32) {
    %c0_i32 = arith.constant 0 : i32
    return %arg0, %arg2 : i32, i32
  }
  func.func @transform_1(%arg0: i32, %arg1: i32, %arg2: i32) -> (i32, i32) {
    %c0_i32 = arith.constant 0 : i32
    return %arg1, %arg2 : i32, i32
  }
  func.func @transform_2(%arg0: i32, %arg1: i32, %arg2: i32) -> (i32, i32) {
    %c0_i32 = arith.constant 0 : i32
    %c0_i32_0 = arith.constant 0 : i32
    return %arg0, %c0_i32 : i32, i32
  }
  func.func @transform_3(%arg0: i32, %arg1: i32, %arg2: i32) -> (i32, i32) {
    %c0_i32 = arith.constant 0 : i32
    %c0_i32_0 = arith.constant 0 : i32
    return %arg1, %c0_i32 : i32, i32
  }
  func.func @transform_4(%arg0: i32, %arg1: i32, %arg2: i32) -> (i32, i32) {
    %c0_i32 = arith.constant 0 : i32
    %c0_i32_0 = arith.constant 0 : i32
    return %c0_i32, %arg1 : i32, i32
  }
  func.func @transform_5(%arg0: i32, %arg1: i32, %arg2: i32) -> (i32, i32) {
    %c0_i32 = arith.constant 0 : i32
    return %arg0, %arg1 : i32, i32
  }
}

</mosaic_0001>

<bundles_post_ra>
// kernel: lowrank_adapter_forward.1
= control target key start
LH: loop header
LB: loop body
LE: loop exit
PB: predicated region body
PF: predicated region fallthrough
CT: control target
= control target key end

     0   :  { %vm25_vm0 = vcmask 261120   ;;  %vm91_vm1 = vcmask 31744   ;;  %v214_v2 = vmov 0.0   ;;  %s316_s0 = inlined_call_operand.vmem [shape: f32[16,32], index: 0, kind: input, shape index: {}]   ;;  %s317_s1 = inlined_call_operand.vmem [shape: f32[32,32], index: 1, kind: input, shape index: {}]   ;;  %s318_s2 = inlined_call_operand.vmem [shape: f32[16,4], index: 2, kind: input, shape index: {}]   ;;  %s319_s3 = inlined_call_operand.vmem [shape: f32[32,4], index: 3, kind: input, shape index: {}]   ;;  %s320_s4 = inlined_call_operand.vmem [shape: f32[1,32], index: 4, kind: input, shape index: {}]   ;;  %s321_s5 = inlined_call_operand.hbm [shape: f32[16,32], index: 5, kind: output, shape index: {}]  }
   0x1   :  { %v35_v0 = vld [vmem:[%s317_s1 + $0x18] sm:$0xff]  ;;  %26 = vst.msk [vmem:[#allocation2] sm:$0xff] %vm25_vm0, %v214_v2  ;;  %v34_v3 = vld [vmem:[%s317_s1 + $0x10] sm:$0xff] }
   0x2   :  { %175 = vmatpush.xpose.msk.msra.mxu2 %vm25_vm0, %v35_v0  ;;  %163 = vmatpush.xpose.msk.msra.mxu0 %vm25_vm0, %v35_v0  ;;  %v90_v1 = vld [vmem:[%s319_s3 + $0x18] sm:$0xff]  ;;  %27 = vst.msk [vmem:[#allocation2 + $0x8] sm:$0xff] %vm25_vm0, %v214_v2  ;;  %v89_v4 = vld [vmem:[%s319_s3 + $0x10] sm:$0xff] }
   0x3   :  { %179 = vmatpush.xpose.msk.msra.mxu3 %vm91_vm1, %v90_v1  ;;  %169 = vmatpush.xpose.msk.msra.mxu1 %vm91_vm1, %v90_v1 }
   0x4   :  { %10 = vsyncpa [#allocation3], 0  ;;  %v33_v5 = vld [vmem:[%s317_s1 + $0x8] sm:$0xff]  ;;  %v32_v7 = vld [vmem:[%s317_s1] sm:$0xff]  ;;  %s215_s15 = smov [#allocation2]   ;;  %s151_s19 = sshll.u32 %s321_s5, 4  ;;  %s152_s19 = int_to_ptr.hbm [resolvable:$true] %s151_s19 }
   0x5   :  { %v88_v6 = vld [vmem:[%s319_s3 + $0x8] sm:$0xff]  ;;  %v87_v8 = vld [vmem:[%s319_s3] sm:$0xff]  ;;  %s149_s16 = sshll.u32 %s215_s15, 4  ;;  %s217_s20 = smov 8   ;;  %s150_s16 = int_to_ptr.vmem [resolvable:$true] %s149_s16 }
   0x6   :  { %176 = vmatpush.xpose.msk.msra.mxu2 %vm25_vm0, %v34_v3  ;;  %164 = vmatpush.xpose.msk.msra.mxu0 %vm25_vm0, %v34_v3  ;;  %v31_v9 = vld [vmem:[%s316_s0 + $0x8] sm:$0xff]  ;;  %v30_v10 = vld [vmem:[%s316_s0] sm:$0xff] }
   0x7   :  { %180 = vmatpush.xpose.msk.msra.mxu3 %vm91_vm1, %v89_v4  ;;  %170 = vmatpush.xpose.msk.msra.mxu1 %vm91_vm1, %v89_v4  ;;  %v86_v11 = vld [vmem:[%s318_s2 + $0x8] sm:$0xff]  ;;  %v85_v12 = vld [vmem:[%s318_s2] sm:$0xff] }
   0x8   :  { %v28_v13 = vld [vmem:[#allocation2] sm:$0xff] }
   0x9   :  { %v29_v16 = vld [vmem:[#allocation2 + $0x8] sm:$0xff]  ;;  %v187_v20 = vld [vmem:[%s320_s4] ss:$0 sm:$0xff]  ;;  %s216_s4 = smov 128  }
   0xa   :  { %177 = vmatpush.xpose.msk.msra.mxu2 %vm25_vm0, %v33_v5  ;;  %165 = vmatpush.xpose.msk.msra.mxu0 %vm25_vm0, %v33_v5 }
   0xb   :  { %181 = vmatpush.xpose.msk.msra.mxu3 %vm91_vm1, %v88_v6  ;;  %171 = vmatpush.xpose.msk.msra.mxu1 %vm91_vm1, %v88_v6 }
   0xe   :  { %178 = vmatpush.xpose.msk.msra.mxu2 %vm25_vm0, %v32_v7  ;;  %166 = vmatpush.xpose.msk.msra.mxu0 %vm25_vm0, %v32_v7 }
   0xf   :  { %182 = vmatpush.xpose.msk.msra.mxu3 %vm91_vm1, %v87_v8  ;;  %172 = vmatpush.xpose.msk.msra.mxu1 %vm91_vm1, %v87_v8 }
  0x11   :  { %168 = vmatmul.msk.f32.vlgmr.msra.gmra.mxu2 %vm25_vm0, %v31_v9  ;;  %167 = vmatmul.msk.f32.vlgmr.msra.gmra.mxu0 %vm25_vm0, %v30_v10 }
  0x12   :  { %174 = vmatmul.msk.f32.vlgmr.msra.gmra.mxu3 %vm91_vm1, %v86_v11  ;;  %173 = vmatmul.msk.f32.vlgmr.msra.gmra.mxu1 %vm91_vm1, %v85_v12 }
  0x8e   :  { %v72_v14 = vpop.f32.mrf.mxu0 }
  0x8f   :  { %v78_v15 = vadd.f32 %v72_v14, %v28_v13  ;;  %v127_v19 = vpop.f32.mrf.mxu1 }
  0x91   :  { %80 = vst.msk [vmem:[#allocation2] sm:$0xff] %vm25_vm0, %v78_v15 }
  0x94   :  { %v75_v17 = vpop.f32.mrf.mxu2 }
  0x95   :  { %v79_v18 = vadd.f32 %v75_v17, %v29_v16  ;;  %v130_v24 = vpop.f32.mrf.mxu3 }
  0x97   :  { %81 = vst.msk [vmem:[#allocation2 + $0x8] sm:$0xff] %vm25_vm0, %v79_v18 }
  0x98   :  { %v133_v21 = vld [vmem:[#allocation2] sm:$0xff] }
  0x99   :  { %v135_v22 = vadd.f32 %v133_v21, %v127_v19 }
  0x9b   :  { %v141_v23 = vadd.f32 %v187_v20, %v135_v22 }
  0x9d   :  { %143 = vst.msk [vmem:[#allocation2] sm:$0xff] %vm25_vm0, %v141_v23 }
  0x9e   :  { %v134_v25 = vld [vmem:[#allocation2 + $0x8] sm:$0xff] }
  0x9f   :  { %v136_v26 = vadd.f32 %v134_v25, %v130_v24 }
  0xa1   :  { %v142_v27 = vadd.f32 %v187_v20, %v136_v26 }
  0xa3   :  { %144 = vst.msk [vmem:[#allocation2 + $0x8] sm:$0xff] %vm25_vm0, %v142_v27 }
  0xa4   :  { %157 = dma.vmem_to_hbm [thread:$0]  %s150_s16, 256, %s152_s19, [#allocation3], %s216_s4, %s216_s4, %s217_s20  }
  0xa5   :  { %212 = dma.done.wait [#allocation3], 256  }
  0xa6   :  { %213 = vsyncadd [#allocation3], 4294967040 }
  0xa7   :  { %162 = vsyncpa [#allocation3], 1 }

</bundles_post_ra>
